<compile_context>
chip_gen: v6e
topology: v6e:2x2x1
jax: 0.10.0
libtpu: 0.0.40
codegen_flags: <defaults>
</compile_context>

<pallas_src>
import functools
import math

import jax
import jax.numpy as jnp
from jax.experimental import pallas as pl
from jax.experimental.pallas import tpu as pltpu


def _topk_kernel(embs_ref, scorer_ref, mask_ref, out_ref, *, k):
    # embs_ref:   (N, F)     node embeddings (natural layout, no host transpose)
    # scorer_ref: (1, F)     scoring vector as a lane-dense row
    # mask_ref:   (1, N)     additive mask (0 for real nodes, -inf for padding)
    # out_ref:    (F, K_PAD) out.t(); only the first k lane-columns are meaningful
    embs = embs_ref[...]
    scorer = scorer_ref[...]
    mask = mask_ref[...]

    n = embs.shape[0]
    k_pad = out_ref.shape[1]
    neg_inf = jnp.float32(-jnp.inf)

    # scores[0, v] = <node_embs[v], scorer> / ||scorer|| + mask[v]     (MXU, NT)
    nrm = jnp.sqrt(jnp.sum(scorer * scorer, axis=1, keepdims=True))    # (1, 1)
    raw = jax.lax.dot_general(
        scorer, embs,
        dimension_numbers=(((1,), (1,)), ((), ())),                    # contract F
        preferred_element_type=jnp.float32)                            # (1, N)
    scores = raw / nrm + mask                                          # (1, N)

    lane_ids = jax.lax.broadcasted_iota(jnp.int32, (1, n), 1)          # node id / lane
    col_ids = jax.lax.broadcasted_iota(jnp.int32, (1, k_pad), 1)       # output column id

    # Per-pick selected node index / score rows.  Index n (out of range) yields a
    # zero selection column -> unfilled / never-valid picks stay zero.
    idx_row = jnp.full((1, k_pad), n, jnp.int32)
    val_row = jnp.zeros((1, k_pad), jnp.float32)
    last_idx = jnp.full((1, 1), n, jnp.int32)
    last_val = jnp.zeros((1, 1), jnp.float32)
    s = scores

    # k is small and static: unrolled iterative argmax == topk, fused with the
    # "-inf filter" and pad_with_last_val.  All per-iteration work is on
    # (1, N) / (1, K_PAD) rows -- O(k * N) vector ops total.
    for i in range(k):
        m = jnp.max(s, axis=1, keepdims=True)                          # (1, 1) current max
        idx = jnp.min(jnp.where(s == m, lane_ids, jnp.int32(n)),
                      axis=1, keepdims=True)                           # (1, 1) first argmax
        valid = m > neg_inf                                            # (1, 1)
        sel_idx = jnp.where(valid, idx, last_idx)                      # pad_with_last_val
        sel_val = jnp.where(valid, m, last_val)
        idx_row = jnp.where(col_ids == i, sel_idx, idx_row)
        val_row = jnp.where(col_ids == i, sel_val, val_row)
        s = jnp.where(lane_ids == idx, neg_inf, s)                     # drop current pick
        last_idx = sel_idx
        last_val = sel_val

    # Pure 0/1 selection matrix (N, K_PAD): column i is one-hot at pick i.
    node_ids = jax.lax.broadcasted_iota(jnp.int32, (n, k_pad), 0)
    sel_mat = (node_ids == idx_row).astype(jnp.float32)                # (N, K_PAD)

    # Gather + transpose in one MXU matmul (TN form: contract the N axis of both),
    # then scale each column by tanh(score of its pick).
    gathered = jax.lax.dot_general(
        embs, sel_mat,
        dimension_numbers=(((0,), (0,)), ((), ())),
        preferred_element_type=jnp.float32)                            # (F, K_PAD)

    # TODO(synk): if every node is masked (-inf), PyTorch's pad_with_last_val on
    # an empty index tensor errors; here those columns are left as zeros.
    out_ref[...] = gathered * jnp.tanh(val_row)


def topk_forward(node_embs, scorer, mask, k):
    """node_embs (N, F) f32, scorer (F, 1) f32, mask (N, 1) f32 -> (F, k) f32."""
    n, f_dim = node_embs.shape
    k_pad = pl.cdiv(max(k, 1), 128) * 128            # lane-dense padded output width
    scorer_row = scorer.reshape(1, f_dim)            # lane-dense scorer row
    mask_row = mask.reshape(1, n)

    # Everything lives in VMEM at once; give headroom for intermediates
    # (scores, selection matrix) on top of the operands.
    operand_bytes = 4 * (n * f_dim + f_dim + n + f_dim * k_pad + n * k_pad)
    vmem_limit = int(min(64 * 1024 * 1024, max(4 * 1024 * 1024, 8 * operand_bytes)))

    cost = pl.CostEstimate(
        flops=2 * n * f_dim + 2 * n * f_dim * k_pad + 8 * k * n,
        transcendentals=k_pad + 1,
        bytes_accessed=operand_bytes,
    )

    out_pad = pl.pallas_call(
        functools.partial(_topk_kernel, k=k),
        out_shape=jax.ShapeDtypeStruct((f_dim, k_pad), jnp.float32),
        in_specs=[
            pl.BlockSpec(memory_space=pltpu.MemorySpace.VMEM),
            pl.BlockSpec(memory_space=pltpu.MemorySpace.VMEM),
            pl.BlockSpec(memory_space=pltpu.MemorySpace.VMEM),
        ],
        out_specs=pl.BlockSpec(memory_space=pltpu.MemorySpace.VMEM),
        compiler_params=pltpu.CompilerParams(vmem_limit_bytes=vmem_limit),
        cost_estimate=cost,
    )(node_embs, scorer_row, mask_row)
    return out_pad[:, :k]


def topk_reference(node_embs, scorer, mask, k):
    """Pure-JAX reference mirroring the PyTorch forward."""
    scores = (node_embs @ scorer) / jnp.sqrt(jnp.sum(scorer * scorer))   # (N, 1)
    scores = scores + mask
    flat = scores.reshape(-1)
    vals, idx = jax.lax.top_k(flat, k)
    valid = vals > -jnp.inf
    nvalid = jnp.sum(valid.astype(jnp.int32))
    last = idx[jnp.maximum(nvalid - 1, 0)]
    idx = jnp.where(valid, idx, last)            # u.pad_with_last_val
    out = node_embs[idx] * jnp.tanh(flat[idx])[:, None]
    return out.T                                  # (F, k)


if __name__ == "__main__":
    key = jax.random.PRNGKey(0)

    # Small shapes consistent with the module.
    N = 16        # number of nodes
    feats = 32    # embedding dim (TopK.__init__ `feats`)
    k = 8         # TopK.k

    k_embs, k_scorer = jax.random.split(key, 2)

    node_embs = jax.random.normal(k_embs, (N, feats), jnp.float32)
    # Parameter init matches reset_param: uniform(-1/sqrt(feats), 1/sqrt(feats)).
    stdv = 1.0 / math.sqrt(feats)
    scorer = jax.random.uniform(k_scorer, (feats, 1), jnp.float32, -stdv, stdv)

    # Additive mask: 0 for existing nodes, -inf for non-existing. Only 6 (< k)
    # valid nodes so the "-inf filter + pad_with_last_val" branch is exercised.
    n_valid = 6
    mask = jnp.where(jnp.arange(N)[:, None] < n_valid, 0.0, -jnp.inf).astype(jnp.float32)

    out = topk_forward(node_embs, scorer, mask, k)
    out = jax.block_until_ready(out)

    ref = topk_reference(node_embs, scorer, mask, k)
    assert out.shape == (feats, k)
    assert jnp.allclose(out, ref, atol=1e-4, rtol=1e-4), float(jnp.max(jnp.abs(out - ref)))

    print("KERNEL_OK")
</pallas_src>

<mosaic_0001>
module attributes {stable_mosaic.version = 11 : i64} {
  func.func @_topk_kernel(%arg0: memref<16x32xf32, #tpu.memory_space<vmem>>, %arg1: memref<1x32xf32, #tpu.memory_space<vmem>>, %arg2: memref<1x16xf32, #tpu.memory_space<vmem>>, %arg3: memref<32x128xf32, #tpu.memory_space<vmem>>) attributes {dimension_semantics = [], scalar_prefetch = 0 : i64, scratch_operands = 0 : i64, tpu.core_type = #tpu.core_type<tc>} {
    %c0 = arith.constant 0 : index
    %c0_0 = arith.constant 0 : index
    %0 = vector.load %arg0[%c0, %c0_0] : memref<16x32xf32, #tpu.memory_space<vmem>>, vector<16x32xf32>
    %c0_1 = arith.constant 0 : index
    %c0_2 = arith.constant 0 : index
    %1 = vector.load %arg1[%c0_1, %c0_2] : memref<1x32xf32, #tpu.memory_space<vmem>>, vector<1x32xf32>
    %c0_3 = arith.constant 0 : index
    %c0_4 = arith.constant 0 : index
    %2 = vector.load %arg2[%c0_3, %c0_4] : memref<1x16xf32, #tpu.memory_space<vmem>>, vector<1x16xf32>
    %3 = arith.mulf %1, %1 : vector<1x32xf32>
    %cst = arith.constant dense<0.000000e+00> : vector<1xf32>
    %4 = vector.multi_reduction <add>, %3, %cst [1] : vector<1x32xf32> to vector<1xf32>
    %5 = vector.shape_cast %4 : vector<1xf32> to vector<1x1xf32>
    %6 = math.sqrt %5 : vector<1x1xf32>
    %cst_5 = arith.constant dense<0.000000e+00> : vector<1x16xf32>
    %7 = tpu.matmul %1, %0, %cst_5 {dimension_numbers = #tpu.dot_dimension_numbers<[1], [1], [0], [0], [0, 0, 1, 0], [], []>} : vector<1x32xf32>, vector<16x32xf32>, vector<1x16xf32> -> vector<1x16xf32>
    %8 = vector.broadcast %6 : vector<1x1xf32> to vector<1x16xf32>
    %9 = arith.divf %7, %8 : vector<1x16xf32>
    %10 = arith.addf %9, %2 : vector<1x16xf32>
    %11 = tpu.iota {dimensions = array<i32: 1>} : vector<1x16xi32>
    %12 = tpu.iota {dimensions = array<i32: 1>} : vector<1x128xi32>
    %c16_i32 = arith.constant 16 : i32
    %13 = vector.broadcast %c16_i32 : i32 to vector<1x128xi32>
    %cst_6 = arith.constant 0.000000e+00 : f32
    %14 = vector.broadcast %cst_6 : f32 to vector<1x128xf32>
    %c16_i32_7 = arith.constant 16 : i32
    %15 = vector.broadcast %c16_i32_7 : i32 to vector<1x1xi32>
    %cst_8 = arith.constant 0.000000e+00 : f32
    %16 = vector.broadcast %cst_8 : f32 to vector<1x1xf32>
    %cst_9 = arith.constant dense<0xFF800000> : vector<1xf32>
    %17 = vector.multi_reduction <maximumf>, %10, %cst_9 [1] : vector<1x16xf32> to vector<1xf32>
    %18 = vector.shape_cast %17 : vector<1xf32> to vector<1x1xf32>
    %19 = vector.broadcast %18 : vector<1x1xf32> to vector<1x16xf32>
    %20 = arith.cmpf oeq, %10, %19 : vector<1x16xf32>
    %c16_i32_10 = arith.constant 16 : i32
    %21 = vector.broadcast %c16_i32_10 : i32 to vector<1x16xi32>
    %22 = arith.select %20, %11, %21 : vector<1x16xi1>, vector<1x16xi32>
    %cst_11 = arith.constant dense<2147483647> : vector<1xi32>
    %23 = vector.multi_reduction <minsi>, %22, %cst_11 [1] : vector<1x16xi32> to vector<1xi32>
    %24 = vector.shape_cast %23 : vector<1xi32> to vector<1x1xi32>
    %cst_12 = arith.constant 0xFF800000 : f32
    %25 = vector.broadcast %cst_12 : f32 to vector<1x1xf32>
    %26 = arith.cmpf ogt, %18, %25 : vector<1x1xf32>
    %27 = arith.select %26, %24, %15 : vector<1x1xi1>, vector<1x1xi32>
    %28 = arith.select %26, %18, %16 : vector<1x1xi1>, vector<1x1xf32>
    %c0_i32 = arith.constant 0 : i32
    %29 = vector.broadcast %c0_i32 : i32 to vector<1x128xi32>
    %30 = arith.cmpi eq, %12, %29 : vector<1x128xi32>
    %31 = vector.shape_cast %27 : vector<1x1xi32> to vector<1x1xi32>
    %32 = vector.broadcast %31 : vector<1x1xi32> to vector<1x128xi32>
    %33 = arith.select %30, %32, %13 : vector<1x128xi1>, vector<1x128xi32>
    %c0_i32_13 = arith.constant 0 : i32
    %34 = vector.broadcast %c0_i32_13 : i32 to vector<1x128xi32>
    %35 = arith.cmpi eq, %12, %34 : vector<1x128xi32>
    %36 = vector.shape_cast %28 : vector<1x1xf32> to vector<1x1xf32>
    %37 = vector.broadcast %36 : vector<1x1xf32> to vector<1x128xf32>
    %38 = arith.select %35, %37, %14 : vector<1x128xi1>, vector<1x128xf32>
    %39 = vector.broadcast %24 : vector<1x1xi32> to vector<1x16xi32>
    %40 = arith.cmpi eq, %11, %39 : vector<1x16xi32>
    %cst_14 = arith.constant 0xFF800000 : f32
    %41 = vector.broadcast %cst_14 : f32 to vector<1x16xf32>
    %42 = arith.select %40, %41, %10 : vector<1x16xi1>, vector<1x16xf32>
    %cst_15 = arith.constant dense<0xFF800000> : vector<1xf32>
    %43 = vector.multi_reduction <maximumf>, %42, %cst_15 [1] : vector<1x16xf32> to vector<1xf32>
    %44 = vector.shape_cast %43 : vector<1xf32> to vector<1x1xf32>
    %45 = vector.broadcast %44 : vector<1x1xf32> to vector<1x16xf32>
    %46 = arith.cmpf oeq, %42, %45 : vector<1x16xf32>
    %c16_i32_16 = arith.constant 16 : i32
    %47 = vector.broadcast %c16_i32_16 : i32 to vector<1x16xi32>
    %48 = arith.select %46, %11, %47 : vector<1x16xi1>, vector<1x16xi32>
    %cst_17 = arith.constant dense<2147483647> : vector<1xi32>
    %49 = vector.multi_reduction <minsi>, %48, %cst_17 [1] : vector<1x16xi32> to vector<1xi32>
    %50 = vector.shape_cast %49 : vector<1xi32> to vector<1x1xi32>
    %cst_18 = arith.constant 0xFF800000 : f32
    %51 = vector.broadcast %cst_18 : f32 to vector<1x1xf32>
    %52 = arith.cmpf ogt, %44, %51 : vector<1x1xf32>
    %53 = arith.select %52, %50, %27 : vector<1x1xi1>, vector<1x1xi32>
    %54 = arith.select %52, %44, %28 : vector<1x1xi1>, vector<1x1xf32>
    %c1_i32 = arith.constant 1 : i32
    %55 = vector.broadcast %c1_i32 : i32 to vector<1x128xi32>
    %56 = arith.cmpi eq, %12, %55 : vector<1x128xi32>
    %57 = vector.shape_cast %53 : vector<1x1xi32> to vector<1x1xi32>
    %58 = vector.broadcast %57 : vector<1x1xi32> to vector<1x128xi32>
    %59 = arith.select %56, %58, %33 : vector<1x128xi1>, vector<1x128xi32>
    %c1_i32_19 = arith.constant 1 : i32
    %60 = vector.broadcast %c1_i32_19 : i32 to vector<1x128xi32>
    %61 = arith.cmpi eq, %12, %60 : vector<1x128xi32>
    %62 = vector.shape_cast %54 : vector<1x1xf32> to vector<1x1xf32>
    %63 = vector.broadcast %62 : vector<1x1xf32> to vector<1x128xf32>
    %64 = arith.select %61, %63, %38 : vector<1x128xi1>, vector<1x128xf32>
    %65 = vector.broadcast %50 : vector<1x1xi32> to vector<1x16xi32>
    %66 = arith.cmpi eq, %11, %65 : vector<1x16xi32>
    %cst_20 = arith.constant 0xFF800000 : f32
    %67 = vector.broadcast %cst_20 : f32 to vector<1x16xf32>
    %68 = arith.select %66, %67, %42 : vector<1x16xi1>, vector<1x16xf32>
    %cst_21 = arith.constant dense<0xFF800000> : vector<1xf32>
    %69 = vector.multi_reduction <maximumf>, %68, %cst_21 [1] : vector<1x16xf32> to vector<1xf32>
    %70 = vector.shape_cast %69 : vector<1xf32> to vector<1x1xf32>
    %71 = vector.broadcast %70 : vector<1x1xf32> to vector<1x16xf32>
    %72 = arith.cmpf oeq, %68, %71 : vector<1x16xf32>
    %c16_i32_22 = arith.constant 16 : i32
    %73 = vector.broadcast %c16_i32_22 : i32 to vector<1x16xi32>
    %74 = arith.select %72, %11, %73 : vector<1x16xi1>, vector<1x16xi32>
    %cst_23 = arith.constant dense<2147483647> : vector<1xi32>
    %75 = vector.multi_reduction <minsi>, %74, %cst_23 [1] : vector<1x16xi32> to vector<1xi32>
    %76 = vector.shape_cast %75 : vector<1xi32> to vector<1x1xi32>
    %cst_24 = arith.constant 0xFF800000 : f32
    %77 = vector.broadcast %cst_24 : f32 to vector<1x1xf32>
    %78 = arith.cmpf ogt, %70, %77 : vector<1x1xf32>
    %79 = arith.select %78, %76, %53 : vector<1x1xi1>, vector<1x1xi32>
    %80 = arith.select %78, %70, %54 : vector<1x1xi1>, vector<1x1xf32>
    %c2_i32 = arith.constant 2 : i32
    %81 = vector.broadcast %c2_i32 : i32 to vector<1x128xi32>
    %82 = arith.cmpi eq, %12, %81 : vector<1x128xi32>
    %83 = vector.shape_cast %79 : vector<1x1xi32> to vector<1x1xi32>
    %84 = vector.broadcast %83 : vector<1x1xi32> to vector<1x128xi32>
    %85 = arith.select %82, %84, %59 : vector<1x128xi1>, vector<1x128xi32>
    %c2_i32_25 = arith.constant 2 : i32
    %86 = vector.broadcast %c2_i32_25 : i32 to vector<1x128xi32>
    %87 = arith.cmpi eq, %12, %86 : vector<1x128xi32>
    %88 = vector.shape_cast %80 : vector<1x1xf32> to vector<1x1xf32>
    %89 = vector.broadcast %88 : vector<1x1xf32> to vector<1x128xf32>
    %90 = arith.select %87, %89, %64 : vector<1x128xi1>, vector<1x128xf32>
    %91 = vector.broadcast %76 : vector<1x1xi32> to vector<1x16xi32>
    %92 = arith.cmpi eq, %11, %91 : vector<1x16xi32>
    %cst_26 = arith.constant 0xFF800000 : f32
    %93 = vector.broadcast %cst_26 : f32 to vector<1x16xf32>
    %94 = arith.select %92, %93, %68 : vector<1x16xi1>, vector<1x16xf32>
    %cst_27 = arith.constant dense<0xFF800000> : vector<1xf32>
    %95 = vector.multi_reduction <maximumf>, %94, %cst_27 [1] : vector<1x16xf32> to vector<1xf32>
    %96 = vector.shape_cast %95 : vector<1xf32> to vector<1x1xf32>
    %97 = vector.broadcast %96 : vector<1x1xf32> to vector<1x16xf32>
    %98 = arith.cmpf oeq, %94, %97 : vector<1x16xf32>
    %c16_i32_28 = arith.constant 16 : i32
    %99 = vector.broadcast %c16_i32_28 : i32 to vector<1x16xi32>
    %100 = arith.select %98, %11, %99 : vector<1x16xi1>, vector<1x16xi32>
    %cst_29 = arith.constant dense<2147483647> : vector<1xi32>
    %101 = vector.multi_reduction <minsi>, %100, %cst_29 [1] : vector<1x16xi32> to vector<1xi32>
    %102 = vector.shape_cast %101 : vector<1xi32> to vector<1x1xi32>
    %cst_30 = arith.constant 0xFF800000 : f32
    %103 = vector.broadcast %cst_30 : f32 to vector<1x1xf32>
    %104 = arith.cmpf ogt, %96, %103 : vector<1x1xf32>
    %105 = arith.select %104, %102, %79 : vector<1x1xi1>, vector<1x1xi32>
    %106 = arith.select %104, %96, %80 : vector<1x1xi1>, vector<1x1xf32>
    %c3_i32 = arith.constant 3 : i32
    %107 = vector.broadcast %c3_i32 : i32 to vector<1x128xi32>
    %108 = arith.cmpi eq, %12, %107 : vector<1x128xi32>
    %109 = vector.shape_cast %105 : vector<1x1xi32> to vector<1x1xi32>
    %110 = vector.broadcast %109 : vector<1x1xi32> to vector<1x128xi32>
    %111 = arith.select %108, %110, %85 : vector<1x128xi1>, vector<1x128xi32>
    %c3_i32_31 = arith.constant 3 : i32
    %112 = vector.broadcast %c3_i32_31 : i32 to vector<1x128xi32>
    %113 = arith.cmpi eq, %12, %112 : vector<1x128xi32>
    %114 = vector.shape_cast %106 : vector<1x1xf32> to vector<1x1xf32>
    %115 = vector.broadcast %114 : vector<1x1xf32> to vector<1x128xf32>
    %116 = arith.select %113, %115, %90 : vector<1x128xi1>, vector<1x128xf32>
    %117 = vector.broadcast %102 : vector<1x1xi32> to vector<1x16xi32>
    %118 = arith.cmpi eq, %11, %117 : vector<1x16xi32>
    %cst_32 = arith.constant 0xFF800000 : f32
    %119 = vector.broadcast %cst_32 : f32 to vector<1x16xf32>
    %120 = arith.select %118, %119, %94 : vector<1x16xi1>, vector<1x16xf32>
    %cst_33 = arith.constant dense<0xFF800000> : vector<1xf32>
    %121 = vector.multi_reduction <maximumf>, %120, %cst_33 [1] : vector<1x16xf32> to vector<1xf32>
    %122 = vector.shape_cast %121 : vector<1xf32> to vector<1x1xf32>
    %123 = vector.broadcast %122 : vector<1x1xf32> to vector<1x16xf32>
    %124 = arith.cmpf oeq, %120, %123 : vector<1x16xf32>
    %c16_i32_34 = arith.constant 16 : i32
    %125 = vector.broadcast %c16_i32_34 : i32 to vector<1x16xi32>
    %126 = arith.select %124, %11, %125 : vector<1x16xi1>, vector<1x16xi32>
    %cst_35 = arith.constant dense<2147483647> : vector<1xi32>
    %127 = vector.multi_reduction <minsi>, %126, %cst_35 [1] : vector<1x16xi32> to vector<1xi32>
    %128 = vector.shape_cast %127 : vector<1xi32> to vector<1x1xi32>
    %cst_36 = arith.constant 0xFF800000 : f32
    %129 = vector.broadcast %cst_36 : f32 to vector<1x1xf32>
    %130 = arith.cmpf ogt, %122, %129 : vector<1x1xf32>
    %131 = arith.select %130, %128, %105 : vector<1x1xi1>, vector<1x1xi32>
    %132 = arith.select %130, %122, %106 : vector<1x1xi1>, vector<1x1xf32>
    %c4_i32 = arith.constant 4 : i32
    %133 = vector.broadcast %c4_i32 : i32 to vector<1x128xi32>
    %134 = arith.cmpi eq, %12, %133 : vector<1x128xi32>
    %135 = vector.shape_cast %131 : vector<1x1xi32> to vector<1x1xi32>
    %136 = vector.broadcast %135 : vector<1x1xi32> to vector<1x128xi32>
    %137 = arith.select %134, %136, %111 : vector<1x128xi1>, vector<1x128xi32>
    %c4_i32_37 = arith.constant 4 : i32
    %138 = vector.broadcast %c4_i32_37 : i32 to vector<1x128xi32>
    %139 = arith.cmpi eq, %12, %138 : vector<1x128xi32>
    %140 = vector.shape_cast %132 : vector<1x1xf32> to vector<1x1xf32>
    %141 = vector.broadcast %140 : vector<1x1xf32> to vector<1x128xf32>
    %142 = arith.select %139, %141, %116 : vector<1x128xi1>, vector<1x128xf32>
    %143 = vector.broadcast %128 : vector<1x1xi32> to vector<1x16xi32>
    %144 = arith.cmpi eq, %11, %143 : vector<1x16xi32>
    %cst_38 = arith.constant 0xFF800000 : f32
    %145 = vector.broadcast %cst_38 : f32 to vector<1x16xf32>
    %146 = arith.select %144, %145, %120 : vector<1x16xi1>, vector<1x16xf32>
    %cst_39 = arith.constant dense<0xFF800000> : vector<1xf32>
    %147 = vector.multi_reduction <maximumf>, %146, %cst_39 [1] : vector<1x16xf32> to vector<1xf32>
    %148 = vector.shape_cast %147 : vector<1xf32> to vector<1x1xf32>
    %149 = vector.broadcast %148 : vector<1x1xf32> to vector<1x16xf32>
    %150 = arith.cmpf oeq, %146, %149 : vector<1x16xf32>
    %c16_i32_40 = arith.constant 16 : i32
    %151 = vector.broadcast %c16_i32_40 : i32 to vector<1x16xi32>
    %152 = arith.select %150, %11, %151 : vector<1x16xi1>, vector<1x16xi32>
    %cst_41 = arith.constant dense<2147483647> : vector<1xi32>
    %153 = vector.multi_reduction <minsi>, %152, %cst_41 [1] : vector<1x16xi32> to vector<1xi32>
    %154 = vector.shape_cast %153 : vector<1xi32> to vector<1x1xi32>
    %cst_42 = arith.constant 0xFF800000 : f32
    %155 = vector.broadcast %cst_42 : f32 to vector<1x1xf32>
    %156 = arith.cmpf ogt, %148, %155 : vector<1x1xf32>
    %157 = arith.select %156, %154, %131 : vector<1x1xi1>, vector<1x1xi32>
    %158 = arith.select %156, %148, %132 : vector<1x1xi1>, vector<1x1xf32>
    %c5_i32 = arith.constant 5 : i32
    %159 = vector.broadcast %c5_i32 : i32 to vector<1x128xi32>
    %160 = arith.cmpi eq, %12, %159 : vector<1x128xi32>
    %161 = vector.shape_cast %157 : vector<1x1xi32> to vector<1x1xi32>
    %162 = vector.broadcast %161 : vector<1x1xi32> to vector<1x128xi32>
    %163 = arith.select %160, %162, %137 : vector<1x128xi1>, vector<1x128xi32>
    %c5_i32_43 = arith.constant 5 : i32
    %164 = vector.broadcast %c5_i32_43 : i32 to vector<1x128xi32>
    %165 = arith.cmpi eq, %12, %164 : vector<1x128xi32>
    %166 = vector.shape_cast %158 : vector<1x1xf32> to vector<1x1xf32>
    %167 = vector.broadcast %166 : vector<1x1xf32> to vector<1x128xf32>
    %168 = arith.select %165, %167, %142 : vector<1x128xi1>, vector<1x128xf32>
    %169 = vector.broadcast %154 : vector<1x1xi32> to vector<1x16xi32>
    %170 = arith.cmpi eq, %11, %169 : vector<1x16xi32>
    %cst_44 = arith.constant 0xFF800000 : f32
    %171 = vector.broadcast %cst_44 : f32 to vector<1x16xf32>
    %172 = arith.select %170, %171, %146 : vector<1x16xi1>, vector<1x16xf32>
    %cst_45 = arith.constant dense<0xFF800000> : vector<1xf32>
    %173 = vector.multi_reduction <maximumf>, %172, %cst_45 [1] : vector<1x16xf32> to vector<1xf32>
    %174 = vector.shape_cast %173 : vector<1xf32> to vector<1x1xf32>
    %175 = vector.broadcast %174 : vector<1x1xf32> to vector<1x16xf32>
    %176 = arith.cmpf oeq, %172, %175 : vector<1x16xf32>
    %c16_i32_46 = arith.constant 16 : i32
    %177 = vector.broadcast %c16_i32_46 : i32 to vector<1x16xi32>
    %178 = arith.select %176, %11, %177 : vector<1x16xi1>, vector<1x16xi32>
    %cst_47 = arith.constant dense<2147483647> : vector<1xi32>
    %179 = vector.multi_reduction <minsi>, %178, %cst_47 [1] : vector<1x16xi32> to vector<1xi32>
    %180 = vector.shape_cast %179 : vector<1xi32> to vector<1x1xi32>
    %cst_48 = arith.constant 0xFF800000 : f32
    %181 = vector.broadcast %cst_48 : f32 to vector<1x1xf32>
    %182 = arith.cmpf ogt, %174, %181 : vector<1x1xf32>
    %183 = arith.select %182, %180, %157 : vector<1x1xi1>, vector<1x1xi32>
    %184 = arith.select %182, %174, %158 : vector<1x1xi1>, vector<1x1xf32>
    %c6_i32 = arith.constant 6 : i32
    %185 = vector.broadcast %c6_i32 : i32 to vector<1x128xi32>
    %186 = arith.cmpi eq, %12, %185 : vector<1x128xi32>
    %187 = vector.shape_cast %183 : vector<1x1xi32> to vector<1x1xi32>
    %188 = vector.broadcast %187 : vector<1x1xi32> to vector<1x128xi32>
    %189 = arith.select %186, %188, %163 : vector<1x128xi1>, vector<1x128xi32>
    %c6_i32_49 = arith.constant 6 : i32
    %190 = vector.broadcast %c6_i32_49 : i32 to vector<1x128xi32>
    %191 = arith.cmpi eq, %12, %190 : vector<1x128xi32>
    %192 = vector.shape_cast %184 : vector<1x1xf32> to vector<1x1xf32>
    %193 = vector.broadcast %192 : vector<1x1xf32> to vector<1x128xf32>
    %194 = arith.select %191, %193, %168 : vector<1x128xi1>, vector<1x128xf32>
    %195 = vector.broadcast %180 : vector<1x1xi32> to vector<1x16xi32>
    %196 = arith.cmpi eq, %11, %195 : vector<1x16xi32>
    %cst_50 = arith.constant 0xFF800000 : f32
    %197 = vector.broadcast %cst_50 : f32 to vector<1x16xf32>
    %198 = arith.select %196, %197, %172 : vector<1x16xi1>, vector<1x16xf32>
    %cst_51 = arith.constant dense<0xFF800000> : vector<1xf32>
    %199 = vector.multi_reduction <maximumf>, %198, %cst_51 [1] : vector<1x16xf32> to vector<1xf32>
    %200 = vector.shape_cast %199 : vector<1xf32> to vector<1x1xf32>
    %201 = vector.broadcast %200 : vector<1x1xf32> to vector<1x16xf32>
    %202 = arith.cmpf oeq, %198, %201 : vector<1x16xf32>
    %c16_i32_52 = arith.constant 16 : i32
    %203 = vector.broadcast %c16_i32_52 : i32 to vector<1x16xi32>
    %204 = arith.select %202, %11, %203 : vector<1x16xi1>, vector<1x16xi32>
    %cst_53 = arith.constant dense<2147483647> : vector<1xi32>
    %205 = vector.multi_reduction <minsi>, %204, %cst_53 [1] : vector<1x16xi32> to vector<1xi32>
    %206 = vector.shape_cast %205 : vector<1xi32> to vector<1x1xi32>
    %cst_54 = arith.constant 0xFF800000 : f32
    %207 = vector.broadcast %cst_54 : f32 to vector<1x1xf32>
    %208 = arith.cmpf ogt, %200, %207 : vector<1x1xf32>
    %209 = arith.select %208, %206, %183 : vector<1x1xi1>, vector<1x1xi32>
    %210 = arith.select %208, %200, %184 : vector<1x1xi1>, vector<1x1xf32>
    %c7_i32 = arith.constant 7 : i32
    %211 = vector.broadcast %c7_i32 : i32 to vector<1x128xi32>
    %212 = arith.cmpi eq, %12, %211 : vector<1x128xi32>
    %213 = vector.shape_cast %209 : vector<1x1xi32> to vector<1x1xi32>
    %214 = vector.broadcast %213 : vector<1x1xi32> to vector<1x128xi32>
    %215 = arith.select %212, %214, %189 : vector<1x128xi1>, vector<1x128xi32>
    %c7_i32_55 = arith.constant 7 : i32
    %216 = vector.broadcast %c7_i32_55 : i32 to vector<1x128xi32>
    %217 = arith.cmpi eq, %12, %216 : vector<1x128xi32>
    %218 = vector.shape_cast %210 : vector<1x1xf32> to vector<1x1xf32>
    %219 = vector.broadcast %218 : vector<1x1xf32> to vector<1x128xf32>
    %220 = arith.select %217, %219, %194 : vector<1x128xi1>, vector<1x128xf32>
    %221 = tpu.iota {dimensions = array<i32: 0>} : vector<16x128xi32>
    %222 = vector.broadcast %215 : vector<1x128xi32> to vector<16x128xi32>
    %223 = arith.cmpi eq, %221, %222 : vector<16x128xi32>
    %224 = arith.extui %223 : vector<16x128xi1> to vector<16x128xi32>
    %225 = arith.sitofp %224 : vector<16x128xi32> to vector<16x128xf32>
    %cst_56 = arith.constant dense<0.000000e+00> : vector<32x128xf32>
    %226 = tpu.matmul %0, %225, %cst_56 {dimension_numbers = #tpu.dot_dimension_numbers<[0], [0], [1], [1], [0, 1, 1, 1], [], []>} : vector<16x32xf32>, vector<16x128xf32>, vector<32x128xf32> -> vector<32x128xf32>
    %227 = math.tanh %220 : vector<1x128xf32>
    %228 = vector.broadcast %227 : vector<1x128xf32> to vector<32x128xf32>
    %229 = arith.mulf %226, %228 : vector<32x128xf32>
    %c0_57 = arith.constant 0 : index
    %c0_58 = arith.constant 0 : index
    %230 = vector.load %arg3[%c0_57, %c0_58] : memref<32x128xf32, #tpu.memory_space<vmem>>, vector<32x128xf32>
    tpu.vector_store %arg3[%c0_57, %c0_58], %229 {strides = array<i32>} : memref<32x128xf32, #tpu.memory_space<vmem>>, vector<32x128xf32>,
    return
  }
}

</mosaic_0001>

<bundles_post_ra>
// kernel: tpu_custom_call.1
= control target key start
LH: loop header
LB: loop body
LE: loop exit
PB: predicated region body
PF: predicated region fallthrough
CT: control target
= control target key end

     0   :  { %8 = vsyncpa [#allocation3], 0  ;;  %s817_s0 = inlined_call_operand.hbm [shape: f32[16,32], index: 0, kind: input, shape index: {}]   ;;  %s818_s1 = inlined_call_operand.vmem [shape: f32[1,32], index: 1, kind: input, shape index: {}]   ;;  %s819_s2 = inlined_call_operand.vmem [shape: f32[1,16], index: 2, kind: input, shape index: {}]   ;;  %s820_s3 = inlined_call_operand.hbm [shape: f32[32,128], index: 3, kind: output, shape index: {}]  }
   0x1   :  { %9 = vsyncpa [#allocation4], 0  ;;  %s620_s12 = smov [#allocation2]  }
   0x2   :  { %s15_s13 = sshll.u32 %s620_s12, 4  ;;  %s16_s13 = int_to_ptr.vmem [resolvable:$true] %s15_s13 }
   0x3   :  { %s584_s14 = scalar_lea.vmem %s16_s13, 256  ;;  %p589_p1 = scmp.lt.s32.totalorder %s16_s13, %s16_s13 }
   0x4   :  { %p585_p0 = scmp.ne.s32.totalorder %s16_s13, %s584_s14  ;;  %p590_p2 = scmp.lt.s32.totalorder %s584_s14, %s584_s14 }
   0x6   :  { %p591_p3 = por %p590_p2, %p589_p1 }
   0x8   :  { %p592_p4 = pnand %p591_p3, %p585_p0 }
   0xa   :  { %595 = shalt.err (!%p592_p4)
}
   0xb   :  { %s621_s15 = smov 128   ;;  %s622_s16 = smov 8  }
   0xc   :  { %21 = dma.hbm_to_vmem [thread:$0]  %s817_s0, 256, %s16_s13, [#allocation3], %s621_s15, %s621_s15, %s622_s16  }
   0xd   :  { %616 = dma.done.wait [#allocation3], 256  }
   0xe   :  { %617 = vsyncadd [#allocation3], 4294967040  ;;  %v623_v0 = vmov 0.0   ;;  %vm624_vm0 = vmmov 0   ;;  %vm45_vm1 = vcmask 261120   ;;  %v653_v1 = vld [vmem:[#allocation2 + $0x8] sm:$0xff]  ;;  %v128_v19 = vlaneseq }
   0xf   :  { %546 = vmatprep.subr.mxu0 %v623_v0  ;;  %550 = vmatprep.mubr.msk.f32.mxu0 %vm624_vm0, %v623_v0  ;;  %v31_v2 = vld [vmem:[%s818_s1] sm:$0x1]  ;;  %vm34_vm2 = vcmask 253952   ;;  %vm130_vm5 = vcmask 122880  }
  0x10   :  { %547 = vmatpush3.xpose.msk.msra.mxu0 %vm45_vm1, %v653_v1  ;;  %v33_v3 = vmul.f32 %v31_v2, %v31_v2  ;;  %v659_v4 = vld [vmem:[#allocation2] sm:$0xff]  ;;  %v667_v20 = vand.u32 127, %v128_v19 }
  0x11   :  { %548 = vmatprep.subr.mxu0 %v623_v0  ;;  %v32_v13 = vld [vmem:[%s819_s2] sm:$0x1]  ;;  %s626_s2 = smov [#allocation5]  }
  0x12   :  { %v35_v5 = vsel %vm34_vm2, %v33_v3, 0.0  ;;  %vm154_vm12 = vcmp.eq.s32.totalorder %v667_v20, 0  ;;  %vm182_vm14 = vcmp.eq.s32.totalorder %v667_v20, 1  ;;  %s514_s21 = sshll.u32 %s626_s2, 4  ;;  %s515_s21 = int_to_ptr.vmem [resolvable:$true] %s514_s21 }
  0x13   :  { %36 = vadd.xlane.f32.xlu0 %v35_v5  ;;  %s596_s22 = scalar_lea.vmem %s515_s21, 512  ;;  %p601_p6 = scmp.lt.s32.totalorder %s515_s21, %s515_s21 }
  0x14   :  { %549 = vmatpush3.xpose.msk.msra.mxu0 %vm45_vm1, %v659_v4  ;;  %p597_p5 = scmp.ne.s32.totalorder %s515_s21, %s596_s22  ;;  %p602_p7 = scmp.lt.s32.totalorder %s596_s22, %s596_s22 }
  0x16   :  { %p603_p8 = por %p602_p7, %p601_p6 }
  0x17   :  { %551 = vmatmul.mubr.msk.f32.vlgmr.msra.gmra.mxu0 %vm45_vm1, %v31_v2 }
  0x18   :  { %p604_p9 = pnand %p603_p8, %p597_p5 }
  0x9c   :  { %v37_v6 = vpop.xlane.xlu0 %36 }
  0x9d   :  { %570 = vrsqrt.f32 %v37_v6  ;;  %vm40_vm3 = vcmp.eq.f32.partialorder %v37_v6, inf  ;;  %v43_v9 = vand.u32 2147483648, %v37_v6  ;;  %vm42_vm4 = vcmp.eq.f32.partialorder %v37_v6, 0.0 }
  0xaa   :  { %v571_v7 = vpop.eup %570 }
  0xab   :  { %v39_v8 = vmul.f32 %v571_v7, %v37_v6 }
  0xad   :  { %v41_v10 = vsel %vm40_vm3, %v37_v6, %v39_v8  ;;  %vm210_vm3 = vcmp.eq.s32.totalorder %v667_v20, 2 }
  0xae   :  { %v44_v11 = vsel %vm42_vm4, %v43_v9, %v41_v10 }
  0xaf   :  { %572 = vrcp.f32 %v44_v11 }
  0xbc   :  { %v573_v12 = vpop.eup %572 }
  0xd7   :  { %v121_v14 = vpop.f32.mrf.mxu0 }
  0xd8   :  { %v126_v15 = vmul.f32 %v573_v12, %v121_v14 }
  0xd9   :  { %v552_v16 = vpop.f32.mrf.mxu0 }
  0xda   :  { %v127_v17 = vadd.f32 %v126_v15, %v32_v13 }
  0xdc   :  { %v131_v18 = vsel %vm130_vm5, %v127_v17, -inf }
  0xdd   :  { %132 = vmax.xlane.f32.xlu0 %v131_v18 }
 0x166   :  { %v669_v21 = vpop.xlane.xlu0 %132 }
 0x167   :  { %vm134_vm6 = vcmp.eq.f32.partialorder %v127_v17, %v669_v21  ;;  %vm151_vm11 = vcmp.gt.f32.partialorder %v669_v21, -inf }
 0x168   :  { %v135_v22 = vsel %vm134_vm6, %v667_v20, 16 }
 0x169   :  { %v136_v23 = vsel %vm130_vm5, %v135_v22, 2147483647 }
 0x16a   :  { %v138_v24 = vshra.s32 %v136_v23, 16  ;;  %v137_v26 = vand.u32 65535, %v136_v23 }
 0x16c   :  { %v140_v25 = vcvt.s32.f32 %v138_v24  ;;  %v139_v28 = vcvt.s32.f32 %v137_v26 }
 0x16e   :  { %141 = vmin.xlane.f32.xlu1 %v140_v25 }
 0x1f7   :  { %v142_v27 = vpop.xlane.xlu1 %141 }
 0x1f8   :  { %vm143_vm7 = vcmp.eq.f32.partialorder %v140_v25, %v142_v27  ;;  %v148_v30 = vcvt.f32.s32 %v142_v27 }
 0x1f9   :  { %v144_v29 = vsel %vm143_vm7, %v139_v28, inf }
 0x1fa   :  { %145 = vmin.xlane.f32.xlu1 %v144_v29  ;;  %v149_v32 = vshll.u32 %v148_v30, 16 }
 0x283   :  { %v146_v31 = vpop.xlane.xlu1 %145 }
 0x284   :  { %v147_v33 = vcvt.f32.s32 %v146_v31 }
 0x286   :  { %v150_v34 = vadd.s32 %v149_v32, %v147_v33 }
 0x288   :  { %vm157_vm8 = vcmp.eq.s32.totalorder %v667_v20, %v150_v34  ;;  %v152_v50 = vsel %vm151_vm11, %v150_v34, 16 }
 0x289   :  { %v158_v35 = vsel %vm157_vm8, -inf, %v127_v17  ;;  %v155_v52 = vsel %vm154_vm12, %v152_v50, 16 }
 0x28a   :  { %v159_v36 = vsel %vm130_vm5, %v158_v35, -inf }
 0x28b   :  { %160 = vmax.xlane.f32.xlu0 %v159_v36 }
 0x314   :  { %v676_v37 = vpop.xlane.xlu0 %160 }
 0x315   :  { %vm162_vm9 = vcmp.eq.f32.partialorder %v158_v35, %v676_v37  ;;  %vm179_vm13 = vcmp.gt.f32.partialorder %v676_v37, -inf }
 0x316   :  { %v163_v38 = vsel %vm162_vm9, %v667_v20, 16  ;;  %vm238_vm9 = vcmp.eq.s32.totalorder %v667_v20, 3 }
 0x317   :  { %v164_v39 = vsel %vm130_vm5, %v163_v38, 2147483647 }
 0x318   :  { %v166_v40 = vshra.s32 %v164_v39, 16  ;;  %v165_v42 = vand.u32 65535, %v164_v39 }
 0x31a   :  { %v168_v41 = vcvt.s32.f32 %v166_v40  ;;  %v167_v44 = vcvt.s32.f32 %v165_v42 }
 0x31c   :  { %169 = vmin.xlane.f32.xlu1 %v168_v41 }
 0x3a5   :  { %v170_v43 = vpop.xlane.xlu1 %169 }
 0x3a6   :  { %vm171_vm10 = vcmp.eq.f32.partialorder %v168_v41, %v170_v43  ;;  %v176_v46 = vcvt.f32.s32 %v170_v43 }
 0x3a7   :  { %v172_v45 = vsel %vm171_vm10, %v167_v44, inf }
 0x3a8   :  { %173 = vmin.xlane.f32.xlu0 %v172_v45  ;;  %v177_v48 = vshll.u32 %v176_v46, 16 }
 0x431   :  { %v174_v47 = vpop.xlane.xlu0 %173 }
 0x432   :  { %v175_v49 = vcvt.f32.s32 %v174_v47 }
 0x434   :  { %v178_v51 = vadd.s32 %v177_v48, %v175_v49 }
 0x436   :  { %v180_v53 = vsel %vm179_vm13, %v178_v51, %v152_v50  ;;  %vm185_vm15 = vcmp.eq.s32.totalorder %v667_v20, %v178_v51 }
 0x437   :  { %v183_v54 = vsel %vm182_vm14, %v180_v53, %v155_v52  ;;  %v186_v55 = vsel %vm185_vm15, -inf, %v158_v35 }
 0x438   :  { %v187_v56 = vsel %vm130_vm5, %v186_v55, -inf }
 0x439   :  { %188 = vmax.xlane.f32.xlu1 %v187_v56 }
 0x4c2   :  { %v695_v57 = vpop.xlane.xlu1 %188 }
 0x4c3   :  { %vm190_vm0 = vcmp.eq.f32.partialorder %v186_v55, %v695_v57  ;;  %vm207_vm2 = vcmp.gt.f32.partialorder %v695_v57, -inf }
 0x4c4   :  { %v191_v58 = vsel %vm190_vm0, %v667_v20, 16 }
 0x4c5   :  { %v192_v59 = vsel %vm130_vm5, %v191_v58, 2147483647 }
 0x4c6   :  { %v194_v60 = vshra.s32 %v192_v59, 16  ;;  %v193_v62 = vand.u32 65535, %v192_v59 }
 0x4c8   :  { %v196_v61 = vcvt.s32.f32 %v194_v60  ;;  %v195_v0 = vcvt.s32.f32 %v193_v62 }
 0x4ca   :  { %197 = vmin.xlane.f32.xlu0 %v196_v61 }
 0x553   :  { %v198_v63 = vpop.xlane.xlu0 %197 }
 0x554   :  { %vm199_vm1 = vcmp.eq.f32.partialorder %v196_v61, %v198_v63  ;;  %v204_v3 = vcvt.f32.s32 %v198_v63 }
 0x555   :  { %v200_v2 = vsel %vm199_vm1, %v195_v0, inf }
 0x556   :  { %201 = vmin.xlane.f32.xlu1 %v200_v2  ;;  %v205_v6 = vshll.u32 %v204_v3, 16 }
 0x5df   :  { %v202_v5 = vpop.xlane.xlu1 %201 }
 0x5e0   :  { %v203_v7 = vcvt.f32.s32 %v202_v5 }
 0x5e2   :  { %v206_v8 = vadd.s32 %v205_v6, %v203_v7 }
 0x5e4   :  { %v208_v9 = vsel %vm207_vm2, %v206_v8, %v180_v53  ;;  %vm213_vm4 = vcmp.eq.s32.totalorder %v667_v20, %v206_v8 }
 0x5e5   :  { %v211_v10 = vsel %vm210_vm3, %v208_v9, %v183_v54  ;;  %v214_v11 = vsel %vm213_vm4, -inf, %v186_v55  ;;  %vm823_vm4 = vcmp.eq.s32.totalorder %v667_v20, 4 }
 0x5e6   :  { %v215_v12 = vsel %vm130_vm5, %v214_v11, -inf }
 0x5e7   :  { %216 = vmax.xlane.f32.xlu0 %v215_v12 }
 0x670   :  { %v708_v13 = vpop.xlane.xlu0 %216 }
 0x671   :  { %vm218_vm6 = vcmp.eq.f32.partialorder %v214_v11, %v708_v13  ;;  %vm235_vm8 = vcmp.gt.f32.partialorder %v708_v13, -inf }
 0x672   :  { %v219_v14 = vsel %vm218_vm6, %v667_v20, 16 }
 0x673   :  { %v220_v15 = vsel %vm130_vm5, %v219_v14, 2147483647 }
 0x674   :  { %v222_v16 = vshra.s32 %v220_v15, 16  ;;  %v221_v18 = vand.u32 65535, %v220_v15 }
 0x676   :  { %v224_v17 = vcvt.s32.f32 %v222_v16  ;;  %v223_v23 = vcvt.s32.f32 %v221_v18 }
 0x678   :  { %225 = vmin.xlane.f32.xlu1 %v224_v17 }
 0x701   :  { %v226_v22 = vpop.xlane.xlu1 %225 }
 0x702   :  { %vm227_vm7 = vcmp.eq.f32.partialorder %v224_v17, %v226_v22  ;;  %v232_v25 = vcvt.f32.s32 %v226_v22 }
 0x703   :  { %v228_v24 = vsel %vm227_vm7, %v223_v23, inf }
 0x704   :  { %229 = vmin.xlane.f32.xlu0 %v228_v24  ;;  %v233_v27 = vshll.u32 %v232_v25, 16 }
 0x78d   :  { %v230_v26 = vpop.xlane.xlu0 %229 }
 0x78e   :  { %v231_v28 = vcvt.f32.s32 %v230_v26 }
 0x790   :  { %v234_v29 = vadd.s32 %v233_v27, %v231_v28 }
 0x792   :  { %v236_v30 = vsel %vm235_vm8, %v234_v29, %v208_v9  ;;  %vm241_vm10 = vcmp.eq.s32.totalorder %v667_v20, %v234_v29 }
 0x793   :  { %v239_v31 = vsel %vm238_vm9, %v236_v30, %v211_v10  ;;  %v242_v32 = vsel %vm241_vm10, -inf, %v214_v11 }
 0x794   :  { %v243_v33 = vsel %vm130_vm5, %v242_v32, -inf }
 0x795   :  { %244 = vmax.xlane.f32.xlu1 %v243_v33 }
 0x81e   :  { %v721_v34 = vpop.xlane.xlu1 %244 }
 0x81f   :  { %vm246_vm15 = vcmp.eq.f32.partialorder %v242_v32, %v721_v34  ;;  %vm263_vm1 = vcmp.gt.f32.partialorder %v721_v34, -inf }
 0x820   :  { %v247_v35 = vsel %vm246_vm15, %v667_v20, 16 }
 0x821   :  { %v248_v36 = vsel %vm130_vm5, %v247_v35, 2147483647 }
 0x822   :  { %v250_v38 = vshra.s32 %v248_v36, 16  ;;  %v249_v40 = vand.u32 65535, %v248_v36 }
 0x824   :  { %v252_v39 = vcvt.s32.f32 %v250_v38  ;;  %v251_v42 = vcvt.s32.f32 %v249_v40 }
 0x826   :  { %253 = vmin.xlane.f32.xlu0 %v252_v39 }
 0x8af   :  { %v254_v41 = vpop.xlane.xlu0 %253 }
 0x8b0   :  { %vm255_vm0 = vcmp.eq.f32.partialorder %v252_v39, %v254_v41  ;;  %v260_v44 = vcvt.f32.s32 %v254_v41 }
 0x8b1   :  { %v256_v43 = vsel %vm255_vm0, %v251_v42, inf  ;;  %vm821_vm0 = vcmp.eq.s32.totalorder %v667_v20, 5 }
 0x8b2   :  { %257 = vmin.xlane.f32.xlu1 %v256_v43  ;;  %v261_v46 = vshll.u32 %v260_v44, 16 }
 0x93b   :  { %v258_v45 = vpop.xlane.xlu1 %257 }
 0x93c   :  { %v259_v47 = vcvt.f32.s32 %v258_v45 }
 0x93e   :  { %v262_v48 = vadd.s32 %v261_v46, %v259_v47 }
 0x940   :  { %v264_v49 = vsel %vm263_vm1, %v262_v48, %v236_v30  ;;  %vm269_vm6 = vcmp.eq.s32.totalorder %v667_v20, %v262_v48  ;;  %v354_v48 = vshrl.u32 %v128_v19, 7 }
 0x941   :  { %v267_v50 = vsel %vm823_vm4, %v264_v49, %v239_v31  ;;  %v270_v51 = vsel %vm269_vm6, -inf, %v242_v32 }
 0x942   :  { %v271_v52 = vsel %vm130_vm5, %v270_v51, -inf }
 0x943   :  { %272 = vmax.xlane.f32.xlu0 %v271_v52 }
 0x9cc   :  { %v734_v53 = vpop.xlane.xlu0 %272 }
 0x9cd   :  { %vm274_vm7 = vcmp.eq.f32.partialorder %v270_v51, %v734_v53  ;;  %vm291_vm15 = vcmp.gt.f32.partialorder %v734_v53, -inf }
 0x9ce   :  { %v275_v54 = vsel %vm274_vm7, %v667_v20, 16 }
 0x9cf   :  { %v276_v55 = vsel %vm130_vm5, %v275_v54, 2147483647 }
 0x9d0   :  { %v278_v56 = vshra.s32 %v276_v55, 16  ;;  %v277_v59 = vand.u32 65535, %v276_v55 }
 0x9d2   :  { %v280_v58 = vcvt.s32.f32 %v278_v56  ;;  %v279_v61 = vcvt.s32.f32 %v277_v59  ;;  %v625_v56 = vmov 1.0  }
 0x9d4   :  { %281 = vmin.xlane.f32.xlu1 %v280_v58 }
 0xa5d   :  { %v282_v60 = vpop.xlane.xlu1 %281 }
 0xa5e   :  { %vm283_vm10 = vcmp.eq.f32.partialorder %v280_v58, %v282_v60  ;;  %v288_v63 = vcvt.f32.s32 %v282_v60  ;;  %v153_v58 = vsel %vm151_vm11, %v669_v21, 0.0  ;;  %vm824_vm11 = vcmp.eq.s32.totalorder %v667_v20, 4 }
 0xa5f   :  { %v284_v62 = vsel %vm283_vm10, %v279_v61, inf  ;;  %v181_v59 = vsel %vm179_vm13, %v676_v37, %v153_v58  ;;  %v156_v61 = vsel %vm154_vm12, %v153_v58, 0.0  ;;  %vm825_vm12 = vcmp.eq.s32.totalorder %v667_v20, 5 }
 0xa60   :  { %285 = vmin.xlane.f32.xlu0 %v284_v62  ;;  %v289_v2 = vshll.u32 %v288_v63, 16  ;;  %v209_v60 = vsel %vm207_vm2, %v695_v57, %v181_v59  ;;  %v184_v63 = vsel %vm182_vm14, %v181_v59, %v156_v61  ;;  %vm826_vm13 = vcmp.eq.s32.totalorder %v667_v20, 6 }
 0xa61   :  { %v237_v62 = vsel %vm235_vm8, %v708_v13, %v209_v60  ;;  %v212_v37 = vsel %vm210_vm3, %v209_v60, %v184_v63 }
 0xa62   :  { %v265_v21 = vsel %vm263_vm1, %v721_v34, %v237_v62 }
 0xa63   :  { %v293_v57 = vsel %vm291_vm15, %v734_v53, %v265_v21 }
 0xae9   :  { %v286_v0 = vpop.xlane.xlu0 %285 }
 0xaea   :  { %v287_v3 = vcvt.f32.s32 %v286_v0  ;;  %v240_v0 = vsel %vm238_vm9, %v237_v62, %v212_v37 }
 0xaec   :  { %v290_v5 = vadd.s32 %v289_v2, %v287_v3  ;;  %v268_v2 = vsel %vm824_vm11, %v265_v21, %v240_v0 }
 0xaed   :  { %v296_v34 = vsel %vm825_vm12, %v293_v57, %v268_v2 }
 0xaee   :  { %v292_v6 = vsel %vm291_vm15, %v290_v5, %v264_v49  ;;  %vm297_vm6 = vcmp.eq.s32.totalorder %v667_v20, %v290_v5 }
 0xaef   :  { %v298_v7 = vsel %vm297_vm6, -inf, %v270_v51  ;;  %v295_v8 = vsel %vm821_vm0, %v292_v6, %v267_v50  ;;  %v355_v50 = vadd.s32 8, %v354_v48  ;;  %v358_v51 = vsub.s32 0, %v354_v48 }
 0xaf0   :  { %v299_v9 = vsel %vm130_vm5, %v298_v7, -inf }
 0xaf1   :  { %300 = vmax.xlane.f32.xlu1 %v299_v9 }
 0xb7a   :  { %v747_v10 = vpop.xlane.xlu1 %300 }
 0xb7b   :  { %vm302_vm7 = vcmp.eq.f32.partialorder %v298_v7, %v747_v10  ;;  %vm319_vm6 = vcmp.gt.f32.partialorder %v747_v10, -inf }
 0xb7c   :  { %v303_v11 = vsel %vm302_vm7, %v667_v20, 16  ;;  %vm822_vm7 = vcmp.eq.s32.totalorder %v667_v20, 6  ;;  %v321_v13 = vsel %vm319_vm6, %v747_v10, %v293_v57 }
 0xb7d   :  { %v304_v12 = vsel %vm130_vm5, %v303_v11, 2147483647  ;;  %v324_v5 = vsel %vm826_vm13, %v321_v13, %v296_v34 }
 0xb7e   :  { %v306_v14 = vshra.s32 %v304_v12, 16  ;;  %v305_v16 = vand.u32 65535, %v304_v12 }
 0xb80   :  { %v308_v15 = vcvt.s32.f32 %v306_v14  ;;  %v307_v18 = vcvt.s32.f32 %v305_v16 }
 0xb82   :  { %309 = vmin.xlane.f32.xlu0 %v308_v15 }
 0xc0b   :  { %v310_v17 = vpop.xlane.xlu0 %309 }
 0xc0c   :  { %vm311_vm10 = vcmp.eq.f32.partialorder %v308_v15, %v310_v17  ;;  %v316_v23 = vcvt.f32.s32 %v310_v17 }
 0xc0d   :  { %v312_v22 = vsel %vm311_vm10, %v307_v18, inf }
 0xc0e   :  { %313 = vmin.xlane.f32.xlu1 %v312_v22  ;;  %v317_v25 = vshll.u32 %v316_v23, 16 }
 0xc97   :  { %v314_v24 = vpop.xlane.xlu1 %313 }
 0xc98   :  { %v315_v26 = vcvt.f32.s32 %v314_v24 }
 0xc9a   :  { %v318_v27 = vadd.s32 %v317_v25, %v315_v26 }
 0xc9c   :  { %v320_v28 = vsel %vm319_vm6, %v318_v27, %v292_v6  ;;  %vm325_vm0 = vcmp.eq.s32.totalorder %v667_v20, %v318_v27 }
 0xc9d   :  { %v326_v29 = vsel %vm325_vm0, -inf, %v298_v7  ;;  %v323_v30 = vsel %vm822_vm7, %v320_v28, %v295_v8  ;;  %vm398_vm7 = vcmask 130048  }
 0xc9e   :  { %v327_v31 = vsel %vm130_vm5, %v326_v29, -inf }
 0xc9f   :  { %328 = vmax.xlane.f32.xlu0 %v327_v31 }
 0xd28   :  { %v329_v32 = vpop.xlane.xlu0 %328 }
 0xd29   :  { %vm330_vm10 = vcmp.eq.f32.partialorder %v326_v29, %v329_v32 }
 0xd2a   :  { %v331_v33 = vsel %vm330_vm10, %v667_v20, 16  ;;  %vm350_vm10 = vcmp.eq.s32.totalorder %v667_v20, 7 }
 0xd2b   :  { %v332_v35 = vsel %vm130_vm5, %v331_v33, 2147483647  ;;  %vm347_vm5 = vcmp.gt.f32.partialorder %v329_v32, -inf }
 0xd2c   :  { %v334_v36 = vshra.s32 %v332_v35, 16  ;;  %v333_v39 = vand.u32 65535, %v332_v35  ;;  %v349_v3 = vsel %vm347_vm5, %v329_v32, %v321_v13 }
 0xd2d   :  { %v352_v53 = vsel %vm350_vm10, %v349_v3, %v324_v5 }
 0xd2e   :  { %v336_v38 = vcvt.s32.f32 %v334_v36  ;;  %v335_v41 = vcvt.s32.f32 %v333_v39  ;;  %574 = vtanh.f32 %v352_v53 }
 0xd30   :  { %337 = vmin.xlane.f32.xlu1 %v336_v38 }
 0xd3b   :  { %v575_v6 = vpop.eup %574 }
 0xd3c   :  { %v500_v7 = vrot.slane %v575_v6, %v358_v51 }
 0xd63   :  { %366 = vxpose.xlu1.b32.start [1/2] (short) (narrow) %v659_v4, 32 }
 0xd67   :  { %367 = vxpose.xlu1.b32.end [2/2] (short) (narrow) %v653_v1, 32 }
 0xdb9   :  { %v338_v40 = vpop.xlane.xlu1 %337 }
 0xdba   :  { %vm339_vm0 = vcmp.eq.f32.partialorder %v336_v38, %v338_v40  ;;  %v344_v44 = vcvt.f32.s32 %v338_v40 }
 0xdbb   :  { %v340_v42 = vsel %vm339_vm0, %v335_v41, inf }
 0xdbc   :  { %341 = vmin.xlane.f32.xlu0 %v340_v42  ;;  %v345_v46 = vshll.u32 %v344_v44, 16 }
 0xddf   :  { %v382_v43 = vpop.trf.xlu1 }
 0xde0   :  { %557 = vmatprep.mubr.msk.f32.mxu1 %vm398_vm7, %v382_v43 }
 0xde3   :  { %v383_v4 = vpop.trf.xlu1 }
 0xde7   :  { %v384_v55 = vpop.trf.xlu1 }
 0xdeb   :  { %v385_v19 = vpop.trf.xlu1 }
 0xe45   :  { %v342_v45 = vpop.xlane.xlu0 %341 }
 0xe46   :  { %v343_v47 = vcvt.f32.s32 %v342_v45 }
 0xe48   :  { %v346_v49 = vadd.s32 %v345_v46, %v343_v47 }
 0xe4a   :  { %v348_v1 = vsel %vm347_vm5, %v346_v49, %v320_v28 }
 0xe4b   :  { %v351_v52 = vsel %vm350_vm10, %v348_v1, %v323_v30 }
 0xe4c   :  { %v359_v54 = vrot.slane %v351_v52, %v358_v51 }
 0xe4e   :  { %vm361_vm0 = vcmp.eq.s32.totalorder %v355_v50, %v359_v54  ;;  %vm360_vm4 = vcmp.eq.s32.totalorder %v354_v48, %v359_v54 }
 0xe4f   :  { %553 = vmatprep.subr.msk.mxu1 %vm361_vm0, %v625_v56 }
 0xe50   :  { %554 = vmatpush3.msk.msra.mxu1 %vm361_vm0, %v625_v56 }
 0xe51   :  { %555 = vmatprep.subr.msk.mxu1 %vm360_vm4, %v625_v56 }
 0xe52   :  { %556 = vmatpush3.msk.msra.mxu1 %vm360_vm4, %v625_v56 }
 0xe53   :  { %558 = vmatmul.mubr.msk.f32.vlgmr.msra.gmra.mxu1 %vm398_vm7, %v383_v4 }
 0xe54   :  { %560 = vmatprep.mubr.msk.f32.mxu1 %vm398_vm7, %v384_v55 }
 0xe57   :  { %561 = vmatmul.mubr.msk.f32.gmra.mxu1 %vm398_vm7, %v385_v19 }
 0xf13   :  { %v559_v8 = vpop.f32.mrf.mxu1 }
 0xf14   :  { %v502_v9 = vmul.f32 %v559_v8, %v500_v7 }
 0xf15   :  { %v477_v10 = vpop.f32.mrf.mxu1 }
 0xf16   :  { %506 = vst [vmem:[#allocation5 + $0x8] sm:$0xff] %v502_v9  ;;  %v501_v11 = vmul.f32 %v500_v7, %v477_v10 }
 0xf17   :  { %v562_v12 = vpop.f32.mrf.mxu1 }
 0xf18   :  { %505 = vst [vmem:[#allocation5] sm:$0xff] %v501_v11  ;;  %v504_v14 = vmul.f32 %v562_v12, %v500_v7 }
 0xf19   :  { %v487_v15 = vpop.f32.mrf.mxu1 }
 0xf1a   :  { %508 = vst [vmem:[#allocation5 + $0x18] sm:$0xff] %v504_v14  ;;  %v503_v16 = vmul.f32 %v500_v7, %v487_v15 }
 0xf1c   :  { %507 = vst [vmem:[#allocation5 + $0x10] sm:$0xff] %v503_v16 }
 0xf1d   :  { %607 = shalt.err (!%p604_p9)
}
 0xf1e   :  { %520 = dma.vmem_to_hbm [thread:$0]  %s515_s21, 512, %s820_s3, [#allocation4], %s621_s15, %s621_s15, %s622_s16  }
 0xf1f   :  { %618 = dma.done.wait [#allocation4], 512  }
 0xf20   :  { %619 = vsyncadd [#allocation4], 4294966784 }
 0xf21   :  { %524 = vsyncpa [#allocation3], 1 }
 0xf22   :  { %525 = vsyncpa [#allocation4], 1 }

</bundles_post_ra>
